<compile_context>
chip_gen: v7x
topology: tpu7x:2x2x1
jax: 0.10.0
libtpu: 0.0.40
codegen_flags: <defaults>
</compile_context>

<pallas_src>
import functools

import jax
import jax.numpy as jnp
import numpy as np
from jax.experimental import pallas as pl
from jax.experimental.pallas import tpu as pltpu


def _leaky(v, slope=0.2):
    # torch.nn.LeakyReLU(0.2)
    return jnp.where(v >= 0, v, slope * v)


def dgc_kernel(x_ref, a_blk_ref, pool_ref, mask_ref,
               w_sw_ref, b_sw_ref, w_glb_ref, b_glb_ref,
               w_co_g_ref, w_co_x_ref, b_co_ref,
               w_dyn_ref, b_dyn_ref, o_ref, *, num_batches):
    """Whole batch in one shot; activations live as a packed (C, B*N) slab."""
    f32 = jnp.float32
    cd = x_ref.dtype          # MXU operand dtype (float32 or bfloat16)

    def mm(a, b):             # MXU matmul, f32 accumulation
        return jnp.dot(a.astype(cd), b.astype(cd), preferred_element_type=f32)

    x = x_ref[...]                                                  # (C, B*N)
    x_f32 = x.astype(f32)

    # ---------------- static GCN ----------------
    # leaky(x_b @ W_adj^T) for all batches at once: A_blk = kron(I_B, W_adj^T).
    s1 = _leaky(mm(x, a_blk_ref[...]))                              # (C, B*N)
    out_static = _leaky(mm(w_sw_ref[...], s1) + b_sw_ref[...])      # (Co, B*N)
    x2 = x_f32 + out_static                                         # (C, B*N); requires Co == C

    # --------- construct dynamic graph ----------
    # Per-batch mean over nodes, already broadcast back to every node column.
    x_glb = mm(x2, pool_ref[...])                                   # (C, B*N)
    g = _leaky(mm(w_glb_ref[...], x_glb) + b_glb_ref[...])          # (C, B*N)
    # conv_create_co_mat on concat([g, x2], channel axis), split into 2 matmuls.
    adj_logits = (mm(w_co_g_ref[...], g)
                  + mm(w_co_x_ref[...], x2)
                  + b_co_ref[...])                                  # (N, B*N)
    dyn_adj = jax.nn.sigmoid(adj_logits)                            # (N, B*N)

    # ---------------- dynamic GCN ----------------
    # Per-batch x2_b @ dyn_adj_b == x2 @ blockdiag_b(dyn_adj_b): build the block
    # diagonal by stacking dyn_adj B times along sublanes and masking.
    dyn_blk = (jnp.concatenate([dyn_adj] * num_batches, axis=0)
               * mask_ref[...])                                     # (B*N, B*N)
    y = _leaky(mm(x2, dyn_blk))                                     # (C, B*N)
    z = _leaky(mm(w_dyn_ref[...], y) + b_dyn_ref[...])              # (Co, B*N)

    o_ref[...] = z.astype(o_ref.dtype)


def dynamic_graph_convolution(x, p, *, compute_dtype=jnp.float32):
    """x: (B, C, N); p: raw PyTorch-layout weights. Returns (B, Co, N)."""
    B, C, N = x.shape
    Co = p["w_dyn"].shape[0]
    if Co != C:
        raise ValueError(
            f"residual `x + out_static` requires out_features == in_features "
            f"(got out_features={Co}, in_features={C})")
    BN = B * N
    cd = compute_dtype
    f32 = jnp.float32

    # Pack batch along the lane axis: (B, C, N) -> (C, B*N).
    x_packed = jnp.transpose(x, (1, 0, 2)).reshape(C, BN).astype(cd)

    eye_b = jnp.eye(B, dtype=f32)
    a_blk = jnp.kron(eye_b, p["w_adj"].astype(f32).T).astype(cd)           # (BN, BN)
    pool = jnp.kron(eye_b, jnp.full((N, N), 1.0 / N, f32)).astype(cd)      # (BN, BN)
    mask = jnp.kron(eye_b, jnp.ones((N, N), f32))                          # (BN, BN), f32

    w_co = p["w_co"]
    vmem = pl.BlockSpec(memory_space=pltpu.MemorySpace.VMEM)

    out_packed = pl.pallas_call(
        functools.partial(dgc_kernel, num_batches=B),
        out_shape=jax.ShapeDtypeStruct((Co, BN), x.dtype),
        in_specs=[vmem] * 13,
        out_specs=vmem,
        # At realistic sizes: add a grid over B*N/Co, set vmem_limit_bytes, and
        # use a 2-way "parallel" axis on v7x. Single call is optimal at these shapes.
    )(
        x_packed, a_blk, pool, mask,
        p["w_sw"].astype(cd), p["b_sw"].reshape(Co, 1).astype(f32),
        p["w_glb"].astype(cd), p["b_glb"].reshape(C, 1).astype(f32),
        w_co[:, :C].astype(cd), w_co[:, C:].astype(cd),
        p["b_co"].reshape(N, 1).astype(f32),
        p["w_dyn"].astype(cd), p["b_dyn"].reshape(Co, 1).astype(f32),
    )

    # Unpack (Co, B*N) -> (B, Co, N).
    return jnp.transpose(out_packed.reshape(Co, B, N), (1, 0, 2))


def reference_forward(x, w_adj, w_sw, b_sw, w_glb, b_glb, w_co, b_co, w_dyn, b_dyn):
    """Pure-JAX reference matching the PyTorch module semantics exactly."""
    leaky = lambda v: jnp.where(v >= 0, v, 0.2 * v)
    # static gcn
    s1 = leaky(jnp.einsum('bcn,mn->bcm', x, w_adj))
    out_static = leaky(jnp.einsum('oc,bcn->bon', w_sw, s1) + b_sw[None, :, None])
    x2 = x + out_static
    # dynamic graph construction
    xg = jnp.mean(x2, axis=-1, keepdims=True)
    g = leaky(jnp.einsum('oc,bcn->bon', w_glb, xg) + b_glb[None, :, None])
    g_exp = jnp.broadcast_to(g, x2.shape)
    cat = jnp.concatenate([g_exp, x2], axis=1)
    adj = jax.nn.sigmoid(jnp.einsum('oc,bcn->bon', w_co, cat) + b_co[None, :, None])
    # dynamic gcn
    y = leaky(jnp.matmul(x2, adj))
    z = leaky(jnp.einsum('oc,bcn->bon', w_dyn, y) + b_dyn[None, :, None])
    return z


if __name__ == "__main__":
    B, in_features, out_features, num_nodes = 2, 32, 32, 8
    C, Co, N = in_features, out_features, num_nodes

    key = jax.random.PRNGKey(0)
    ks = jax.random.split(key, 10)
    x = jax.random.normal(ks[0], (B, C, N), jnp.float32)

    # Deterministic synthetic parameters (shapes follow the nn.Conv1d modules).
    w_adj = 0.1 * jax.random.normal(ks[1], (N, N), jnp.float32)      # static_adj[0].weight
    w_sw = 0.1 * jax.random.normal(ks[2], (Co, C), jnp.float32)      # static_weight[0].weight
    b_sw = 0.1 * jax.random.normal(ks[3], (Co,), jnp.float32)
    w_glb = 0.1 * jax.random.normal(ks[4], (C, C), jnp.float32)      # conv_global.weight
    b_glb = 0.1 * jax.random.normal(ks[5], (C,), jnp.float32)
    w_co = 0.1 * jax.random.normal(ks[6], (N, 2 * C), jnp.float32)   # conv_create_co_mat.weight
    b_co = 0.1 * jax.random.normal(ks[7], (N,), jnp.float32)
    w_dyn = 0.1 * jax.random.normal(ks[8], (Co, C), jnp.float32)     # dynamic_weight.weight
    b_dyn = 0.1 * jax.random.normal(ks[9], (Co,), jnp.float32)

    params = dict(w_adj=w_adj, w_sw=w_sw, b_sw=b_sw, w_glb=w_glb, b_glb=b_glb,
                  w_co=w_co, b_co=b_co, w_dyn=w_dyn, b_dyn=b_dyn)

    ref = reference_forward(x, w_adj, w_sw, b_sw, w_glb, b_glb, w_co, b_co, w_dyn, b_dyn)

    # f32 operands: tight check.
    out = jax.block_until_ready(dynamic_graph_convolution(x, params))
    np.testing.assert_allclose(np.asarray(out), np.asarray(ref), rtol=5e-5, atol=5e-5)

    # bf16 MXU operands with f32 accumulation (v6e/v7x fast path): loose check.
    out_bf16 = jax.block_until_ready(
        dynamic_graph_convolution(x, params, compute_dtype=jnp.bfloat16))
    np.testing.assert_allclose(np.asarray(out_bf16), np.asarray(ref), rtol=5e-2, atol=5e-2)

    print("KERNEL_OK")
</pallas_src>

<mosaic_0001>
module attributes {stable_mosaic.version = 11 : i64} {
  func.func @dgc_kernel(%arg0: memref<32x16xf32, #tpu.memory_space<vmem>>, %arg1: memref<16x16xf32, #tpu.memory_space<vmem>>, %arg2: memref<16x16xf32, #tpu.memory_space<vmem>>, %arg3: memref<16x16xf32, #tpu.memory_space<vmem>>, %arg4: memref<32x32xf32, #tpu.memory_space<vmem>>, %arg5: memref<32x1xf32, #tpu.memory_space<vmem>>, %arg6: memref<32x32xf32, #tpu.memory_space<vmem>>, %arg7: memref<32x1xf32, #tpu.memory_space<vmem>>, %arg8: memref<8x32xf32, #tpu.memory_space<vmem>>, %arg9: memref<8x32xf32, #tpu.memory_space<vmem>>, %arg10: memref<8x1xf32, #tpu.memory_space<vmem>>, %arg11: memref<32x32xf32, #tpu.memory_space<vmem>>, %arg12: memref<32x1xf32, #tpu.memory_space<vmem>>, %arg13: memref<32x16xf32, #tpu.memory_space<vmem>>) attributes {dimension_semantics = [], scalar_prefetch = 0 : i64, scratch_operands = 0 : i64, tpu.core_type = #tpu.core_type<tc>} {
    %c0 = arith.constant 0 : index
    %c0_0 = arith.constant 0 : index
    %0 = vector.load %arg0[%c0, %c0_0] : memref<32x16xf32, #tpu.memory_space<vmem>>, vector<32x16xf32>
    %c0_1 = arith.constant 0 : index
    %c0_2 = arith.constant 0 : index
    %1 = vector.load %arg1[%c0_1, %c0_2] : memref<16x16xf32, #tpu.memory_space<vmem>>, vector<16x16xf32>
    %cst = arith.constant dense<0.000000e+00> : vector<32x16xf32>
    %2 = tpu.matmul %0, %1, %cst {dimension_numbers = #tpu.dot_dimension_numbers<[1], [0], [0], [1], [0, 0, 1, 1], [], []>} : vector<32x16xf32>, vector<16x16xf32>, vector<32x16xf32> -> vector<32x16xf32>
    %cst_3 = arith.constant 0.000000e+00 : f32
    %3 = vector.broadcast %cst_3 : f32 to vector<32x16xf32>
    %4 = arith.cmpf oge, %2, %3 : vector<32x16xf32>
    %cst_4 = arith.constant 2.000000e-01 : f32
    %5 = vector.broadcast %cst_4 : f32 to vector<32x16xf32>
    %6 = arith.mulf %5, %2 : vector<32x16xf32>
    %7 = arith.select %4, %2, %6 : vector<32x16xi1>, vector<32x16xf32>
    %c0_5 = arith.constant 0 : index
    %c0_6 = arith.constant 0 : index
    %8 = vector.load %arg4[%c0_5, %c0_6] : memref<32x32xf32, #tpu.memory_space<vmem>>, vector<32x32xf32>
    %cst_7 = arith.constant dense<0.000000e+00> : vector<32x16xf32>
    %9 = tpu.matmul %8, %7, %cst_7 {dimension_numbers = #tpu.dot_dimension_numbers<[1], [0], [0], [1], [0, 0, 1, 1], [], []>} : vector<32x32xf32>, vector<32x16xf32>, vector<32x16xf32> -> vector<32x16xf32>
    %c0_8 = arith.constant 0 : index
    %c0_9 = arith.constant 0 : index
    %10 = vector.load %arg5[%c0_8, %c0_9] : memref<32x1xf32, #tpu.memory_space<vmem>>, vector<32x1xf32>
    %11 = vector.broadcast %10 : vector<32x1xf32> to vector<32x16xf32>
    %12 = arith.addf %9, %11 : vector<32x16xf32>
    %cst_10 = arith.constant 0.000000e+00 : f32
    %13 = vector.broadcast %cst_10 : f32 to vector<32x16xf32>
    %14 = arith.cmpf oge, %12, %13 : vector<32x16xf32>
    %cst_11 = arith.constant 2.000000e-01 : f32
    %15 = vector.broadcast %cst_11 : f32 to vector<32x16xf32>
    %16 = arith.mulf %15, %12 : vector<32x16xf32>
    %17 = arith.select %14, %12, %16 : vector<32x16xi1>, vector<32x16xf32>
    %18 = arith.addf %0, %17 : vector<32x16xf32>
    %c0_12 = arith.constant 0 : index
    %c0_13 = arith.constant 0 : index
    %19 = vector.load %arg2[%c0_12, %c0_13] : memref<16x16xf32, #tpu.memory_space<vmem>>, vector<16x16xf32>
    %cst_14 = arith.constant dense<0.000000e+00> : vector<32x16xf32>
    %20 = tpu.matmul %18, %19, %cst_14 {dimension_numbers = #tpu.dot_dimension_numbers<[1], [0], [0], [1], [0, 0, 1, 1], [], []>} : vector<32x16xf32>, vector<16x16xf32>, vector<32x16xf32> -> vector<32x16xf32>
    %c0_15 = arith.constant 0 : index
    %c0_16 = arith.constant 0 : index
    %21 = vector.load %arg6[%c0_15, %c0_16] : memref<32x32xf32, #tpu.memory_space<vmem>>, vector<32x32xf32>
    %cst_17 = arith.constant dense<0.000000e+00> : vector<32x16xf32>
    %22 = tpu.matmul %21, %20, %cst_17 {dimension_numbers = #tpu.dot_dimension_numbers<[1], [0], [0], [1], [0, 0, 1, 1], [], []>} : vector<32x32xf32>, vector<32x16xf32>, vector<32x16xf32> -> vector<32x16xf32>
    %c0_18 = arith.constant 0 : index
    %c0_19 = arith.constant 0 : index
    %23 = vector.load %arg7[%c0_18, %c0_19] : memref<32x1xf32, #tpu.memory_space<vmem>>, vector<32x1xf32>
    %24 = vector.broadcast %23 : vector<32x1xf32> to vector<32x16xf32>
    %25 = arith.addf %22, %24 : vector<32x16xf32>
    %cst_20 = arith.constant 0.000000e+00 : f32
    %26 = vector.broadcast %cst_20 : f32 to vector<32x16xf32>
    %27 = arith.cmpf oge, %25, %26 : vector<32x16xf32>
    %cst_21 = arith.constant 2.000000e-01 : f32
    %28 = vector.broadcast %cst_21 : f32 to vector<32x16xf32>
    %29 = arith.mulf %28, %25 : vector<32x16xf32>
    %30 = arith.select %27, %25, %29 : vector<32x16xi1>, vector<32x16xf32>
    %c0_22 = arith.constant 0 : index
    %c0_23 = arith.constant 0 : index
    %31 = vector.load %arg8[%c0_22, %c0_23] : memref<8x32xf32, #tpu.memory_space<vmem>>, vector<8x32xf32>
    %cst_24 = arith.constant dense<0.000000e+00> : vector<8x16xf32>
    %32 = tpu.matmul %31, %30, %cst_24 {dimension_numbers = #tpu.dot_dimension_numbers<[1], [0], [0], [1], [0, 0, 1, 1], [], []>} : vector<8x32xf32>, vector<32x16xf32>, vector<8x16xf32> -> vector<8x16xf32>
    %c0_25 = arith.constant 0 : index
    %c0_26 = arith.constant 0 : index
    %33 = vector.load %arg9[%c0_25, %c0_26] : memref<8x32xf32, #tpu.memory_space<vmem>>, vector<8x32xf32>
    %cst_27 = arith.constant dense<0.000000e+00> : vector<8x16xf32>
    %34 = tpu.matmul %33, %18, %cst_27 {dimension_numbers = #tpu.dot_dimension_numbers<[1], [0], [0], [1], [0, 0, 1, 1], [], []>} : vector<8x32xf32>, vector<32x16xf32>, vector<8x16xf32> -> vector<8x16xf32>
    %35 = arith.addf %32, %34 : vector<8x16xf32>
    %c0_28 = arith.constant 0 : index
    %c0_29 = arith.constant 0 : index
    %36 = vector.load %arg10[%c0_28, %c0_29] : memref<8x1xf32, #tpu.memory_space<vmem>>, vector<8x1xf32>
    %37 = vector.broadcast %36 : vector<8x1xf32> to vector<8x16xf32>
    %38 = arith.addf %35, %37 : vector<8x16xf32>
    %39 = arith.negf %38 : vector<8x16xf32>
    %40 = math.exp %39 : vector<8x16xf32>
    %cst_30 = arith.constant 1.000000e+00 : f32
    %41 = vector.broadcast %cst_30 : f32 to vector<8x16xf32>
    %42 = arith.addf %41, %40 : vector<8x16xf32>
    %43 = arith.divf %41, %42 : vector<8x16xf32>
    %44 = tpu.concatenate %43, %43 in 0 : vector<8x16xf32>, vector<8x16xf32> -> vector<16x16xf32>
    %c0_31 = arith.constant 0 : index
    %c0_32 = arith.constant 0 : index
    %45 = vector.load %arg3[%c0_31, %c0_32] : memref<16x16xf32, #tpu.memory_space<vmem>>, vector<16x16xf32>
    %46 = arith.mulf %44, %45 : vector<16x16xf32>
    %cst_33 = arith.constant dense<0.000000e+00> : vector<32x16xf32>
    %47 = tpu.matmul %18, %46, %cst_33 {dimension_numbers = #tpu.dot_dimension_numbers<[1], [0], [0], [1], [0, 0, 1, 1], [], []>} : vector<32x16xf32>, vector<16x16xf32>, vector<32x16xf32> -> vector<32x16xf32>
    %cst_34 = arith.constant 0.000000e+00 : f32
    %48 = vector.broadcast %cst_34 : f32 to vector<32x16xf32>
    %49 = arith.cmpf oge, %47, %48 : vector<32x16xf32>
    %cst_35 = arith.constant 2.000000e-01 : f32
    %50 = vector.broadcast %cst_35 : f32 to vector<32x16xf32>
    %51 = arith.mulf %50, %47 : vector<32x16xf32>
    %52 = arith.select %49, %47, %51 : vector<32x16xi1>, vector<32x16xf32>
    %c0_36 = arith.constant 0 : index
    %c0_37 = arith.constant 0 : index
    %53 = vector.load %arg11[%c0_36, %c0_37] : memref<32x32xf32, #tpu.memory_space<vmem>>, vector<32x32xf32>
    %cst_38 = arith.constant dense<0.000000e+00> : vector<32x16xf32>
    %54 = tpu.matmul %53, %52, %cst_38 {dimension_numbers = #tpu.dot_dimension_numbers<[1], [0], [0], [1], [0, 0, 1, 1], [], []>} : vector<32x32xf32>, vector<32x16xf32>, vector<32x16xf32> -> vector<32x16xf32>
    %c0_39 = arith.constant 0 : index
    %c0_40 = arith.constant 0 : index
    %55 = vector.load %arg12[%c0_39, %c0_40] : memref<32x1xf32, #tpu.memory_space<vmem>>, vector<32x1xf32>
    %56 = vector.broadcast %55 : vector<32x1xf32> to vector<32x16xf32>
    %57 = arith.addf %54, %56 : vector<32x16xf32>
    %cst_41 = arith.constant 0.000000e+00 : f32
    %58 = vector.broadcast %cst_41 : f32 to vector<32x16xf32>
    %59 = arith.cmpf oge, %57, %58 : vector<32x16xf32>
    %cst_42 = arith.constant 2.000000e-01 : f32
    %60 = vector.broadcast %cst_42 : f32 to vector<32x16xf32>
    %61 = arith.mulf %60, %57 : vector<32x16xf32>
    %62 = arith.select %59, %57, %61 : vector<32x16xi1>, vector<32x16xf32>
    %c0_43 = arith.constant 0 : index
    %c0_44 = arith.constant 0 : index
    %63 = vector.load %arg13[%c0_43, %c0_44] : memref<32x16xf32, #tpu.memory_space<vmem>>, vector<32x16xf32>
    tpu.vector_store %arg13[%c0_43, %c0_44], %62 {strides = array<i32>} : memref<32x16xf32, #tpu.memory_space<vmem>>, vector<32x16xf32>,
    return
  }
}

</mosaic_0001>

<bundles_post_ra>
// kernel: tpu_custom_call.1
= control target key start
LH: loop header
LB: loop body
LE: loop exit
PB: predicated region body
PF: predicated region fallthrough
CT: control target
= control target key end

     0   :  { %vm50_vm0 = vcmask 130048   ;;  %vm188_vm1 = vcmask 261120   ;;  %v1176_v8 = vmov 0   ;;  %v1177_v42 = vmov 0.0|0.0   ;;  %s1440_s1 = inlined_call_operand.vmem [shape: f32[16,16], index: 1, kind: input, shape index: {}]   ;;  %s1441_s0 = inlined_call_operand.vmem [shape: f32[32,16], index: 0, kind: input, shape index: {}]   ;;  %s1442_s4 = inlined_call_operand.vmem [shape: f32[32,32], index: 4, kind: input, shape index: {}]   ;;  %s1443_s5 = inlined_call_operand.vmem [shape: f32[32,1], index: 5, kind: input, shape index: {}]   ;;  %s1444_s7 = inlined_call_operand.vmem [shape: f32[32,1], index: 7, kind: input, shape index: {}]   ;;  %s1445_s10 = inlined_call_operand.vmem [shape: f32[8,1], index: 10, kind: input, shape index: {}]   ;;  %s1446_s12 = inlined_call_operand.vmem [shape: f32[32,1], index: 12, kind: input, shape index: {}]   ;;  %s1447_s2 = inlined_call_operand.vmem [shape: f32[16,16], index: 2, kind: input, shape index: {}]   ;;  %s1448_s9 = inlined_call_operand.vmem [shape: f32[8,32], index: 9, kind: input, shape index: {}]   ;;  %s1449_s6 = inlined_call_operand.vmem [shape: f32[32,32], index: 6, kind: input, shape index: {}]   ;;  %s1450_s8 = inlined_call_operand.vmem [shape: f32[8,32], index: 8, kind: input, shape index: {}]   ;;  %s1451_s3 = inlined_call_operand.vmem [shape: f32[16,16], index: 3, kind: input, shape index: {}]   ;;  %s1452_s11 = inlined_call_operand.vmem [shape: f32[32,32], index: 11, kind: input, shape index: {}]   ;;  %s1453_s13 = inlined_call_operand.vmem [shape: f32[32,16], index: 13, kind: output, shape index: {}]  }
   0x1   :  { %v48_v0 = vld [vmem:[%s1440_s1] sm:$0xff]  ;;  %v49_v1 = vld [vmem:[%s1440_s1 + $0x8] sm:$0xff]  ;;  %v1271_v5 = vld [vmem:[%s1441_s0 + $0x10] sm:$0xff]  ;;  %1170 = vset.pattern.permute.xlu0 %v1176_v8  ;;  %1171 = vset.pattern.permute.xlu1 %v1176_v8  ;;  %vm1178_vm10 = vmmov 0  }
   0x2   :  { %v1259_v2 = vld [vmem:[%s1441_s0] sm:$0xff]  ;;  %v1118_v3 = vpack.c.bf16 %v49_v1, %v48_v0  ;;  %v1266_v4 = vld [vmem:[%s1441_s0 + $0x8] sm:$0xff]  ;;  %v1280_v6 = vld [vmem:[%s1441_s0 + $0x18] sm:$0xff] }
   0x3   :  { %1028 = vmatprep.mubr.msk.f32.mxu1 %vm50_vm0, %v1259_v2  ;;  %v160_v7 = vld [vmem:[%s1442_s4] sm:$0xff]  ;;  %v166_v10 = vld [vmem:[%s1443_s5 + $0x10] sm:$0xff]  ;;  %v165_v11 = vld [vmem:[%s1443_s5 + $0x8] sm:$0xff] }
   0x4   :  { %1119 = vmatprep.subr.bf16.mxu1 %v1118_v3  ;;  %v164_v9 = vld [vmem:[%s1443_s5] sm:$0xff]  ;;  %180 = vperm.xlu1 %1171, %v166_v10   ;;  %v167_v12 = vld [vmem:[%s1443_s5 + $0x18] sm:$0xff]  ;;  %v406_v14 = vld [vmem:[%s1444_s7 + $0x8] sm:$0xff] }
   0x5   :  { %1121 = vmatpush3.bf16.msra.mxu1 %v1118_v3  ;;  %170 = vperm.xlu0 %1170, %v164_v9   ;;  %v405_v13 = vld [vmem:[%s1444_s7] sm:$0xff]  ;;  %v407_v15 = vld [vmem:[%s1444_s7 + $0x10] sm:$0xff]  ;;  %v408_v16 = vld [vmem:[%s1444_s7 + $0x18] sm:$0xff] }
   0x6   :  { %v686_v17 = vld [vmem:[%s1445_s10] sm:$0xff]  ;;  %v805_v19 = vld [vmem:[%s1446_s12 + $0x8] sm:$0xff]  ;;  %v806_v20 = vld [vmem:[%s1446_s12 + $0x10] sm:$0xff] }
   0x7   :  { %v804_v18 = vld [vmem:[%s1446_s12] sm:$0xff]  ;;  %v807_v21 = vld [vmem:[%s1446_s12 + $0x18] sm:$0xff]  ;;  %v161_v36 = vld [vmem:[%s1442_s4 + $0x8] sm:$0xff] }
   0x8   :  { %1029 = vmatmul.mubr.msk.f32.vlgmr.msra.gmra.mrb[0].mxu1 %vm50_vm0, %v1266_v4  ;;  %185 = vperm.xlu1 %1171, %v167_v12   ;;  %v162_v37 = vld [vmem:[%s1442_s4 + $0x10] sm:$0xff]  ;;  %v163_v38 = vld [vmem:[%s1442_s4 + $0x18] sm:$0xff]  ;;  %v302_v39 = vld [vmem:[%s1447_s2] sm:$0xff] }
   0x9   :  { %1031 = vmatprep.mubr.msk.f32.mxu1 %vm50_vm0, %v1271_v5  ;;  %175 = vperm.xlu0 %1170, %v165_v11   ;;  %v303_v40 = vld [vmem:[%s1447_s2 + $0x8] sm:$0xff] }
   0xa   :  { %v1130_v41 = vpack.c.bf16 %v303_v40, %v302_v39 }
   0xc   :  { %1032 = vmatmul.mubr.msk.f32.gmra.mrb[2].mxu1 %vm50_vm0, %v1280_v6  ;;  %416 = vperm.xlu1 %1171, %v406_v14   ;;  %v402_v14 = vld [vmem:[%s1449_s6 + $0x8] sm:$0xff] }
   0xd   :  { %1042 = vmatprep.mubr.msk.f32.mxu1 %vm188_vm1, %v160_v7  ;;  %411 = vperm.xlu0 %1170, %v405_v13   ;;  %v401_v7 = vld [vmem:[%s1449_s6] sm:$0xff] }
   0xe   :  { %1131 = vmatprep.subr.bf16.mxu0 %v1130_v41 }
   0xf   :  { %1133 = vmatpush3.bf16.msra.mxu0 %v1130_v41  ;;  %v538_v41 = vld [vmem:[%s1450_s8] sm:$0xff] }
  0x10   :  { %426 = vperm.xlu1 %1171, %v408_v16   ;;  %1142 = vmatprep.subr.bf16.mxu0 %v1177_v42  ;;  %v404_v16 = vld [vmem:[%s1449_s6 + $0x18] sm:$0xff] }
  0x11   :  { %421 = vperm.xlu0 %1170, %v407_v15   ;;  %v403_v15 = vld [vmem:[%s1449_s6 + $0x10] sm:$0xff] }
  0x14   :  { %810 = vperm.xlu1 %1171, %v804_v18  }
  0x15   :  { %689 = vperm.xlu0 %1170, %v686_v17  }
  0x18   :  { %820 = vperm.xlu1 %1171, %v806_v20  }
  0x19   :  { %815 = vperm.xlu0 %1170, %v805_v19  }
  0x1d   :  { %825 = vperm.xlu0 %1170, %v807_v21  }
  0x83   :  { %v181_v44 = vpop.permute.xlu1 %180 }
  0x84   :  { %v171_v43 = vpop.permute.xlu0 %170 }
  0x87   :  { %v186_v51 = vpop.permute.xlu1 %185 }
  0x88   :  { %v176_v45 = vpop.permute.xlu0 %175 }
  0x8b   :  { %v417_v19 = vpop.permute.xlu1 %416 }
  0x8c   :  { %v412_v20 = vpop.permute.xlu0 %411 }
  0xdb   :  { %v1030_v22 = vpop.f32.mrb[0].mxu1 }
  0xdc   :  { %vm149_vm2 = vcmp.ge.f32.partialorder %v1030_v22, 0.0  ;;  %v153_v23 = vmul.f32 0.2, %v1030_v22  ;;  %v129_v24 = vpop.f32.mrb[1].mxu1 }
  0xdd   :  { %vm148_vm3 = vcmp.ge.f32.partialorder %v129_v24, 0.0  ;;  %v152_v25 = vmul.f32 0.2, %v129_v24 }
  0xde   :  { %v157_v26 = vsel %vm149_vm2, %v1030_v22, %v153_v23 }
  0xdf   :  { %v156_v27 = vsel %vm148_vm3, %v129_v24, %v152_v25  ;;  %v1033_v28 = vpop.f32.mrb[2].mxu1 }
  0xe0   :  { %vm151_vm4 = vcmp.ge.f32.partialorder %v1033_v28, 0.0  ;;  %v155_v29 = vmul.f32 0.2, %v1033_v28  ;;  %v139_v30 = vpop.f32.mrb[3].mxu1  ;;  %v1122_v31 = vpack.c.bf16 %v157_v26, %v156_v27  ;;  %v427_v26 = vpop.permute.xlu1 %426 }
  0xe1   :  { %vm150_vm5 = vcmp.ge.f32.partialorder %v139_v30, 0.0  ;;  %v154_v32 = vmul.f32 0.2, %v139_v30 }
  0xe2   :  { %v159_v33 = vsel %vm151_vm4, %v1033_v28, %v155_v29  ;;  %1123 = vmatprep.subr.bf16.mxu1 %v1122_v31  ;;  %v422_v29 = vpop.permute.xlu0 %421 }
  0xe3   :  { %v158_v34 = vsel %vm150_vm5, %v139_v30, %v154_v32  ;;  %1125 = vmatpush3.bf16.msra.mxu1 %v1122_v31 }
  0xe4   :  { %v1126_v35 = vpack.c.bf16 %v159_v33, %v158_v34 }
  0xe6   :  { %1127 = vmatprep.subr.bf16.mxu1 %v1126_v35 }
  0xe7   :  { %1129 = vmatpush3.bf16.msra.mxu1 %v1126_v35 }
  0xea   :  { %1043 = vmatmul.mubr.msk.f32.vlgmr.msra.gmra.mrb[4].mxu1 %vm188_vm1, %v161_v36 }
  0xeb   :  { %1045 = vmatprep.mubr.msk.f32.mxu1 %vm188_vm1, %v162_v37 }
  0xee   :  { %1046 = vmatmul.mubr.msk.f32.gmra.mrb[6].mxu1 %vm188_vm1, %v163_v38 }
  0xef   :  { %1066 = vmatprep.mubr.msk.f32.mxu1 %vm188_vm1, %v401_v7  ;;  %v801_v7 = vld [vmem:[%s1452_s11 + $0x8] sm:$0xff] }
 0x1bd   :  { %v1044_v46 = vpop.f32.mrb[4].mxu1 }
 0x1be   :  { %v273_v47 = vadd.f32 %v1044_v46, %v176_v45  ;;  %v267_v48 = vpop.f32.mrb[5].mxu1  ;;  %v690_v46 = vpop.permute.xlu0 %689 }
 0x1bf   :  { %v268_v49 = vadd.f32 %v267_v48, %v171_v43 }
 0x1c0   :  { %vm287_vm6 = vcmp.ge.f32.partialorder %v273_v47, 0.0  ;;  %v291_v50 = vmul.f32 0.2, %v273_v47 }
 0x1c1   :  { %vm286_vm7 = vcmp.ge.f32.partialorder %v268_v49, 0.0  ;;  %v290_v52 = vmul.f32 0.2, %v268_v49  ;;  %v1047_v53 = vpop.f32.mrb[6].mxu1 }
 0x1c2   :  { %v295_v54 = vsel %vm287_vm6, %v273_v47, %v291_v50  ;;  %v283_v55 = vadd.f32 %v1047_v53, %v186_v51  ;;  %v277_v56 = vpop.f32.mrb[7].mxu1  ;;  %v700_v51 = vld [vmem:[%s1451_s3 + $0x8] sm:$0xff] }
 0x1c3   :  { %v1347_v57 = vadd.f32 %v295_v54, %v1266_v4  ;;  %v278_v58 = vadd.f32 %v277_v56, %v181_v44  ;;  %v294_v59 = vsel %vm286_vm7, %v268_v49, %v290_v52  ;;  %v800_v56 = vld [vmem:[%s1452_s11] sm:$0xff] }
 0x1c4   :  { %vm289_vm8 = vcmp.ge.f32.partialorder %v283_v55, 0.0  ;;  %v293_v60 = vmul.f32 0.2, %v283_v55  ;;  %v298_v61 = vadd.f32 %v294_v59, %v1259_v2 }
 0x1c5   :  { %vm288_vm9 = vcmp.ge.f32.partialorder %v278_v58, 0.0  ;;  %v292_v62 = vmul.f32 0.2, %v278_v58 }
 0x1c6   :  { %v297_v63 = vsel %vm289_vm8, %v283_v55, %v293_v60  ;;  %1052 = vmatprep.mubr.msk.f32.mxu0 %vm50_vm0, %v298_v61  ;;  %v1143_v0 = vpack.c.bf16 %v1347_v57, %v298_v61 }
 0x1c7   :  { %v1353_v1 = vadd.f32 %v297_v63, %v1280_v6  ;;  %v296_v3 = vsel %vm288_vm9, %v278_v58, %v292_v62  ;;  %1053 = vmatmul.mubr.msk.f32.vlgmr.msra.gmra.mrb[0].mxu0 %vm50_vm0, %v1347_v57  ;;  %v1179_v6 = vmov 0.0  }
 0x1c8   :  { %v1358_v4 = vadd.f32 %v296_v3, %v1271_v5  ;;  %1144 = vmatpush3.bf16.msra.mxu0 %v1143_v0  ;;  %v539_v5 = vld [vmem:[%s1448_s9] sm:$0xff] }
 0x1c9   :  { %1145 = vmatprep.subr.bf16.mxu0 %v1177_v42 }
 0x1ca   :  { %1055 = vmatprep.mubr.msk.f32.mxu0 %vm50_vm0, %v1358_v4  ;;  %v1146_v2 = vpack.c.bf16 %v1353_v1, %v1358_v4 }
 0x1cb   :  { %1056 = vmatmul.mubr.msk.f32.gmra.mrb[2].mxu0 %vm50_vm0, %v1353_v1 }
 0x1cc   :  { %1147 = vmatpush3.bf16.msra.mxu0 %v1146_v2  ;;  %1080 = vmatprep.mubr.msk.f32.mxu0 %vm1178_vm10, %v1179_v6 }
 0x1cf   :  { %1081 = vmatmul.mubr.msk.f32.vlgmr.msra.gmra.mrb[4].mxu0 %vm188_vm1, %v539_v5 }
 0x1d0   :  { %1098 = vmatprep.mubr.msk.f32.mxu0 %vm50_vm0, %v298_v61 }
 0x29a   :  { %v1054_v8 = vpop.f32.mrb[0].mxu0 }
 0x29b   :  { %v382_v9 = vpop.f32.mrb[1].mxu0 }
 0x29c   :  { %v1134_v10 = vpack.c.bf16 %v1054_v8, %v382_v9  ;;  %v802_v8 = vld [vmem:[%s1452_s11 + $0x10] sm:$0xff]  ;;  %v803_v9 = vld [vmem:[%s1452_s11 + $0x18] sm:$0xff] }
 0x29e   :  { %v1057_v11 = vpop.f32.mrb[2].mxu0  ;;  %1135 = vmatprep.subr.bf16.mxu1 %v1134_v10 }
 0x29f   :  { %v392_v12 = vpop.f32.mrb[3].mxu0  ;;  %1137 = vmatpush3.bf16.msra.mxu1 %v1134_v10  ;;  %v816_v10 = vpop.permute.xlu0 %815 }
 0x2a0   :  { %v1138_v13 = vpack.c.bf16 %v1057_v11, %v392_v12  ;;  %v811_v11 = vpop.permute.xlu1 %810 }
 0x2a2   :  { %1139 = vmatprep.subr.bf16.mxu1 %v1138_v13  ;;  %v609_v17 = vpop.f32.mrb[4].mxu0 }
 0x2a3   :  { %1141 = vmatpush3.bf16.msra.mxu1 %v1138_v13  ;;  %v1082_v18 = vpop.f32.mrb[5].mxu0 }
 0x2a4   :  { %1148 = vmatprep.subr.bf16.mxu1 %v1177_v42 }
 0x2a6   :  { %1067 = vmatmul.mubr.msk.f32.vlgmr.msra.gmra.mrb[8].mxu1 %vm188_vm1, %v402_v14 }
 0x2a7   :  { %1069 = vmatprep.mubr.msk.f32.mxu1 %vm188_vm1, %v403_v15 }
 0x2aa   :  { %1070 = vmatmul.mubr.msk.f32.gmra.mrb[10].mxu1 %vm188_vm1, %v404_v16 }
 0x2ab   :  { %1091 = vmatprep.mubr.msk.f32.mxu1 %vm1178_vm10, %v1179_v6 }
 0x379   :  { %v1068_v21 = vpop.f32.mrb[8].mxu1 }
 0x37a   :  { %v513_v22 = vadd.f32 %v1068_v21, %v417_v19  ;;  %v507_v23 = vpop.f32.mrb[9].mxu1 }
 0x37b   :  { %v508_v24 = vadd.f32 %v507_v23, %v412_v20  ;;  %v821_v20 = vpop.permute.xlu1 %820 }
 0x37c   :  { %vm527_vm11 = vcmp.ge.f32.partialorder %v513_v22, 0.0  ;;  %v531_v25 = vmul.f32 0.2, %v513_v22 }
 0x37d   :  { %vm526_vm12 = vcmp.ge.f32.partialorder %v508_v24, 0.0  ;;  %v530_v27 = vmul.f32 0.2, %v508_v24  ;;  %v1071_v28 = vpop.f32.mrb[10].mxu1 }
 0x37e   :  { %v535_v30 = vsel %vm527_vm11, %v513_v22, %v531_v25  ;;  %v523_v31 = vadd.f32 %v1071_v28, %v427_v26  ;;  %v517_v32 = vpop.f32.mrb[11].mxu1 }
 0x37f   :  { %v534_v33 = vsel %vm526_vm12, %v508_v24, %v530_v27  ;;  %v518_v34 = vadd.f32 %v517_v32, %v422_v29 }
 0x380   :  { %v1149_v35 = vpack.c.bf16 %v535_v30, %v534_v33  ;;  %vm529_vm13 = vcmp.ge.f32.partialorder %v523_v31, 0.0  ;;  %v533_v36 = vmul.f32 0.2, %v523_v31 }
 0x381   :  { %vm528_vm14 = vcmp.ge.f32.partialorder %v518_v34, 0.0  ;;  %v532_v37 = vmul.f32 0.2, %v518_v34 }
 0x382   :  { %v537_v38 = vsel %vm529_vm13, %v523_v31, %v533_v36  ;;  %1150 = vmatpush3.bf16.msra.mxu1 %v1149_v35 }
 0x383   :  { %v536_v39 = vsel %vm528_vm14, %v518_v34, %v532_v37  ;;  %1151 = vmatprep.subr.bf16.mxu1 %v1177_v42  ;;  %v699_v42 = vld [vmem:[%s1451_s3] sm:$0xff] }
 0x384   :  { %v1152_v40 = vpack.c.bf16 %v537_v38, %v536_v39 }
 0x386   :  { %1153 = vmatpush3.bf16.msra.mxu1 %v1152_v40 }
 0x389   :  { %1092 = vmatmul.mubr.msk.f32.vlgmr.msra.gmra.mrb[12].mxu1 %vm188_vm1, %v538_v41 }
 0x45c   :  { %v682_v43 = vpop.f32.mrb[12].mxu1 }
 0x45d   :  { %v683_v44 = vadd.f32 %v682_v43, %v609_v17  ;;  %v1093_v45 = vpop.f32.mrb[13].mxu1  ;;  %v826_v17 = vpop.permute.xlu0 %825 }
 0x45f   :  { %v692_v47 = vadd.f32 %v690_v46, %v683_v44 }
 0x461   :  { %v963_v48 = vmul.f32 -1.442695, %v692_v47 }
 0x463   :  { %1172 = vpow2.f32 %v963_v48 }
 0x46d   :  { %v1173_v49 = vpop.eup %1172 }
 0x46e   :  { %v696_v50 = vadd.f32 1.0, %v1173_v49 }
 0x470   :  { %1174 = vrcp.f32 %v696_v50 }
 0x47a   :  { %v1175_v52 = vpop.eup %1174 }
 0x47b   :  { %v701_v53 = vmul.f32 %v1175_v52, %v699_v42  ;;  %v702_v54 = vmul.f32 %v1175_v52, %v700_v51 }
 0x47d   :  { %v1154_v55 = vpack.c.bf16 %v702_v54, %v701_v53 }
 0x47f   :  { %1155 = vmatprep.subr.bf16.mxu0 %v1154_v55 }
 0x480   :  { %1157 = vmatpush3.bf16.msra.mxu0 %v1154_v55 }
 0x483   :  { %1099 = vmatmul.mubr.msk.f32.vlgmr.msra.gmra.mrb[6].mxu0 %vm50_vm0, %v1347_v57 }
 0x484   :  { %1101 = vmatprep.mubr.msk.f32.mxu0 %vm50_vm0, %v1358_v4 }
 0x487   :  { %1102 = vmatmul.mubr.msk.f32.gmra.mrb[8].mxu0 %vm50_vm0, %v1353_v1 }
 0x488   :  { %1112 = vmatprep.mubr.msk.f32.mxu0 %vm188_vm1, %v800_v56 }
 0x556   :  { %v1100_v58 = vpop.f32.mrb[6].mxu0 }
 0x557   :  { %vm789_vm15 = vcmp.ge.f32.partialorder %v1100_v58, 0.0  ;;  %v793_v59 = vmul.f32 0.2, %v1100_v58  ;;  %v769_v60 = vpop.f32.mrb[7].mxu0 }
 0x558   :  { %vm788_vm2 = vcmp.ge.f32.partialorder %v769_v60, 0.0  ;;  %v792_v61 = vmul.f32 0.2, %v769_v60 }
 0x559   :  { %v797_v62 = vsel %vm789_vm15, %v1100_v58, %v793_v59 }
 0x55a   :  { %v796_v57 = vsel %vm788_vm2, %v769_v60, %v792_v61  ;;  %v1103_v63 = vpop.f32.mrb[8].mxu0 }
 0x55b   :  { %vm791_vm3 = vcmp.ge.f32.partialorder %v1103_v63, 0.0  ;;  %v795_v0 = vmul.f32 0.2, %v1103_v63  ;;  %v779_v3 = vpop.f32.mrb[9].mxu0  ;;  %v1158_v4 = vpack.c.bf16 %v797_v62, %v796_v57 }
 0x55c   :  { %vm790_vm4 = vcmp.ge.f32.partialorder %v779_v3, 0.0  ;;  %v794_v1 = vmul.f32 0.2, %v779_v3 }
 0x55d   :  { %v799_v2 = vsel %vm791_vm3, %v1103_v63, %v795_v0  ;;  %1159 = vmatprep.subr.bf16.mxu0 %v1158_v4 }
 0x55e   :  { %v798_v6 = vsel %vm790_vm4, %v779_v3, %v794_v1  ;;  %1161 = vmatpush3.bf16.msra.mxu0 %v1158_v4 }
 0x55f   :  { %v1162_v5 = vpack.c.bf16 %v799_v2, %v798_v6 }
 0x561   :  { %1163 = vmatprep.subr.bf16.mxu0 %v1162_v5 }
 0x562   :  { %1165 = vmatpush3.bf16.msra.mxu0 %v1162_v5 }
 0x565   :  { %1113 = vmatmul.mubr.msk.f32.vlgmr.msra.gmra.mrb[10].mxu0 %vm188_vm1, %v801_v7 }
 0x566   :  { %1115 = vmatprep.mubr.msk.f32.mxu0 %vm188_vm1, %v802_v8 }
 0x569   :  { %1116 = vmatmul.mubr.msk.f32.gmra.mrb[12].mxu0 %vm188_vm1, %v803_v9 }
 0x638   :  { %v1114_v12 = vpop.f32.mrb[10].mxu0 }
 0x639   :  { %v912_v13 = vadd.f32 %v1114_v12, %v816_v10  ;;  %v906_v14 = vpop.f32.mrb[11].mxu0 }
 0x63a   :  { %v907_v15 = vadd.f32 %v906_v14, %v811_v11 }
 0x63b   :  { %vm926_vm5 = vcmp.ge.f32.partialorder %v912_v13, 0.0  ;;  %v930_v16 = vmul.f32 0.2, %v912_v13 }
 0x63c   :  { %vm925_vm6 = vcmp.ge.f32.partialorder %v907_v15, 0.0  ;;  %v929_v18 = vmul.f32 0.2, %v907_v15  ;;  %v1117_v19 = vpop.f32.mrb[12].mxu0 }
 0x63d   :  { %v934_v21 = vsel %vm926_vm5, %v912_v13, %v930_v16  ;;  %v922_v22 = vadd.f32 %v1117_v19, %v826_v17  ;;  %v916_v23 = vpop.f32.mrb[13].mxu0 }
 0x63e   :  { %938 = vst.msk [vmem:[%s1453_s13 + $0x8] sm:$0xff] %vm50_vm0, %v934_v21  ;;  %v933_v24 = vsel %vm925_vm6, %v907_v15, %v929_v18  ;;  %v917_v25 = vadd.f32 %v916_v23, %v821_v20 }
 0x63f   :  { %937 = vst.msk [vmem:[%s1453_s13] sm:$0xff] %vm50_vm0, %v933_v24  ;;  %vm928_vm1 = vcmp.ge.f32.partialorder %v922_v22, 0.0  ;;  %v932_v26 = vmul.f32 0.2, %v922_v22 }
 0x640   :  { %vm927_vm7 = vcmp.ge.f32.partialorder %v917_v25, 0.0  ;;  %v931_v27 = vmul.f32 0.2, %v917_v25 }
 0x641   :  { %v936_v28 = vsel %vm928_vm1, %v922_v22, %v932_v26 }
 0x642   :  { %940 = vst.msk [vmem:[%s1453_s13 + $0x18] sm:$0xff] %vm50_vm0, %v936_v28  ;;  %v935_v29 = vsel %vm927_vm7, %v917_v25, %v931_v27 }
 0x643   :  { %939 = vst.msk [vmem:[%s1453_s13 + $0x10] sm:$0xff] %vm50_vm0, %v935_v29 }

</bundles_post_ra>
